<compile_context>
chip_gen: v7x
topology: tpu7x:2x2x1
jax: 0.10.0
libtpu: 0.0.40
codegen_flags: <defaults>
</compile_context>

<pallas_src>
import functools

import jax
import jax.numpy as jnp
from jax import lax
from jax.experimental import pallas as pl
from jax.experimental.pallas import tpu as pltpu

LANE = 128          # TPU lane width
HIDDEN = 64         # fc1 output features
IN_F = 3            # fc1 input features
KP_MXU = 16         # K zero-padded for the bf16 MXU path (bf16 sublane tile = 16)


def _round_up(a, m):
    return (a + m - 1) // m * m


def _vmem_class():
    """Coarse generation gate: v4/v5/v6 TensorCores have 128 MiB VMEM ("big");
    v7x (64 MiB) and anything unrecognized are treated conservatively ("small")."""
    try:
        kind = jax.devices()[0].device_kind.lower()
    except Exception:
        return "small"
    if any(tag in kind for tag in ("v4", "v5", "v6")):
        return "big"
    return "small"


def mlp_kernel(x_ref, w1_ref, b1_ref, w2_ref, b2_ref, t_ref, y_ref, loss_ref,
               *, valid_batch, padded, use_mxu):
    # Layouts (batch on the 128-lane axis):
    #   MXU path : x_ref (16, TB) bf16 (rows 3..15 zero), w1_ref (64, 16) bf16
    #   f32 path : x_ref (3, TB)  f32,                    w1_ref (3, 64, 1) f32
    #   b1_ref (64, 1) f32, w2_ref (64, 1) f32, b2_ref (1, 1) f32, t_ref (1, TB) f32
    tb = x_ref.shape[-1]

    if use_mxu:
        # fc1 on the MXU (K is tiny, but the MXU is idle and this frees the VALU
        # slot that used to bind); f32 accumulation.
        h = jnp.dot(w1_ref[...], x_ref[...],
                    preferred_element_type=jnp.float32)           # (64, TB) f32
        h = h + b1_ref[...]
    else:
        # Exact-f32 fallback: K=3 broadcast-FMAs on the VPU.
        h = (w1_ref[0] * x_ref[0:1, :]
             + w1_ref[1] * x_ref[1:2, :]
             + w1_ref[2] * x_ref[2:3, :]
             + b1_ref[...])                                       # (64, TB) f32
    h = jnp.maximum(h, 0.0)                                       # ReLU (VPU, f32)

    # fc2 (N=1): f32 VPU multiply + sublane (XLU) reduction — stays precise.
    y = jnp.sum(w2_ref[...] * h, axis=0, keepdims=True) + b2_ref[...]   # (1, TB)
    y_ref[...] = y                                                 # lane-dense store
    # Note: padded batch columns of y hold nonzero junk (b2 + w2·relu(b1)); they
    # are masked below and sliced off in the wrapper — never consume y_pad raw.

    # Per-tile partial sum-of-squares, kept entirely in f32; sqrt + cross-tile sum
    # happen in the wrapper so the batch axis stays "parallel" (megacore-shardable).
    d = y - t_ref[...]
    if padded:  # static decision; int32 iota bounds the batch to < 2**31 columns.
        col = lax.broadcasted_iota(jnp.int32, (1, tb), 1) + pl.program_id(0) * tb
        d = jnp.where(col < valid_batch, d, 0.0)
    partial = jnp.sum(d * d, axis=1, keepdims=True)                # (1, 1)
    loss_ref[...] = jnp.broadcast_to(partial, (1, LANE))           # lane-dense block


def mlp_forward(x, w1, b1, w2, b2, target, *, block_b=None,
                compute_dtype=jnp.bfloat16):
    """x: (B, 3), target: (B, 1); params in PyTorch layout:
       w1: (64, 3), b1: (64,), w2: (1, 64), b2: (1,).
       Returns (y: (B, 1) f32, loss: f32 scalar), matching
       (fc2(relu(fc1(x))), torch.dist(y, target, 2)).

       compute_dtype=jnp.bfloat16 (default): fc1 runs on the MXU with bf16
       operands (fast path, ~1e-2 relative on y from input quantization only).
       compute_dtype=jnp.float32: exact f32 VPU path (matches reference to 1e-5)."""
    B = x.shape[0]
    cdtype = jnp.dtype(compute_dtype)
    use_mxu = cdtype != jnp.dtype(jnp.float32)
    kp = KP_MXU if use_mxu else IN_F

    # Generation-gated tile cap / VMEM budget.
    if _vmem_class() == "big":
        cap, vmem_limit = 32768, 96 * 1024 * 1024   # 128 MiB physical VMEM chips
    else:
        cap, vmem_limit = 16384, None               # v7x/unknown: default scoped VMEM

    b_aligned = _round_up(B, LANE)
    if block_b is None:
        # Biggest tile under the cap, but >= 2 tiles when B allows (megacore).
        tb = min(cap, max(LANE, _round_up((b_aligned + 1) // 2, LANE)))
    else:
        tb = min(_round_up(block_b, LANE), max(LANE, b_aligned))
    bp = _round_up(B, tb)
    num_tiles = bp // tb
    padded = bp != B

    # Wrapper-side layout prep: one fused pad+transpose per tensor.
    # TODO(synk): callers that can already produce x as (3, B) (and bf16) should
    # pass it that way upstream to skip this extra HBM pass entirely.
    xt = jnp.pad(x.T.astype(cdtype), ((0, kp - IN_F), (0, bp - B)))     # (kp, bp)
    tt = jnp.pad(target.astype(jnp.float32).T, ((0, 0), (0, bp - B)))   # (1, bp)
    if use_mxu:
        w1p = jnp.pad(w1.astype(cdtype), ((0, 0), (0, kp - IN_F)))      # (64, kp)
        w1_spec = pl.BlockSpec((HIDDEN, kp), lambda i: (0, 0))
    else:
        w1p = w1.T[:, :, None].astype(jnp.float32)                      # (3, 64, 1)
        w1_spec = pl.BlockSpec((IN_F, HIDDEN, 1), lambda i: (0, 0, 0))
    b1c = b1.reshape(HIDDEN, 1).astype(jnp.float32)                     # (64, 1)
    w2c = w2.T.astype(jnp.float32)                                      # (64, 1)
    b2s = b2.reshape(1, 1).astype(jnp.float32)                          # (1, 1)

    kernel = functools.partial(mlp_kernel, valid_batch=B, padded=padded,
                               use_mxu=use_mxu)

    cp_kwargs = dict(dimension_semantics=("parallel",))   # batch axis megacore-shards
    if vmem_limit is not None:
        cp_kwargs["vmem_limit_bytes"] = vmem_limit

    y_pad, loss_parts = pl.pallas_call(
        kernel,
        out_shape=(
            jax.ShapeDtypeStruct((1, bp), jnp.float32),                 # y, lane-dense
            jax.ShapeDtypeStruct((1, num_tiles * LANE), jnp.float32),   # per-tile SSE
        ),
        grid_spec=pltpu.PrefetchScalarGridSpec(
            num_scalar_prefetch=0,
            grid=(num_tiles,),
            in_specs=[
                pl.BlockSpec((kp, tb), lambda i: (0, i)),       # x tile (batch on lanes)
                w1_spec,                                        # w1, VMEM-resident
                pl.BlockSpec((HIDDEN, 1), lambda i: (0, 0)),    # b1, resident
                pl.BlockSpec((HIDDEN, 1), lambda i: (0, 0)),    # w2, resident
                pl.BlockSpec((1, 1), lambda i: (0, 0)),         # b2, resident
                pl.BlockSpec((1, tb), lambda i: (0, i)),        # target tile
            ],
            out_specs=(
                pl.BlockSpec((1, tb), lambda i: (0, i)),        # y tile
                pl.BlockSpec((1, LANE), lambda i: (0, i)),      # partial-loss block
            ),
        ),
        compiler_params=pltpu.CompilerParams(**cp_kwargs),
    )(xt, w1p, b1c, w2c, b2s, tt)

    y = y_pad[0, :B].reshape(B, 1)
    # Each (1,128) loss block holds 128 identical copies of that tile's partial SSE:
    # sum everything and rescale by the exact power-of-two 1/128 (no strided gather).
    loss = jnp.sqrt(jnp.sum(loss_parts) * (1.0 / LANE))
    return y, loss


def init_params(key):
    # PyTorch nn.Linear default init: U(-1/sqrt(fan_in), 1/sqrt(fan_in)).
    k1, k2, k3, k4 = jax.random.split(key, 4)
    bound1 = 1.0 / jnp.sqrt(3.0)
    bound2 = 1.0 / jnp.sqrt(64.0)
    w1 = jax.random.uniform(k1, (64, 3), jnp.float32, -bound1, bound1)   # (out, in)
    b1 = jax.random.uniform(k2, (64,), jnp.float32, -bound1, bound1)
    w2 = jax.random.uniform(k3, (1, 64), jnp.float32, -bound2, bound2)
    b2 = jax.random.uniform(k4, (1,), jnp.float32, -bound2, bound2)
    return w1, b1, w2, b2


if __name__ == "__main__":
    key = jax.random.PRNGKey(0)
    k_params, k_x, k_t = jax.random.split(key, 3)
    w1, b1, w2, b2 = init_params(k_params)

    def ref_forward(x, target):
        h = jnp.maximum(x @ w1.T + b1, 0.0)
        y = h @ w2.T + b2
        return y, jnp.sqrt(jnp.sum((y - target) ** 2))

    def ref_forward_quant(x, target):
        # Mirrors the bf16 MXU path: only x and w1 are quantized; the rest is f32.
        xq = x.astype(jnp.bfloat16).astype(jnp.float32)
        w1q = w1.astype(jnp.bfloat16).astype(jnp.float32)
        h = jnp.maximum(xq @ w1q.T + b1, 0.0)
        y = jnp.sum(h * w2[0], axis=-1, keepdims=True) + b2
        return y, jnp.sqrt(jnp.sum((y - target) ** 2))

    fwd = jax.jit(mlp_forward, static_argnames=("block_b", "compute_dtype"))

    # 1) Small single-tile check on the exact f32 path (tight tolerance).
    B = 8
    x = jax.random.normal(k_x, (B, 3), jnp.float32)
    target = jax.random.normal(k_t, (B, 1), jnp.float32)
    y, loss = fwd(x, w1, b1, w2, b2, target, compute_dtype=jnp.float32)
    jax.block_until_ready((y, loss))
    y_ref, loss_ref = ref_forward(x, target)
    assert jnp.allclose(y, y_ref, atol=1e-5, rtol=1e-5)
    assert jnp.allclose(loss, loss_ref, atol=1e-5, rtol=1e-5)

    # 2) Multi-tile check (3 grid steps, last tile masked), explicit tiny tile, f32.
    B2 = 300
    x2 = jax.random.normal(jax.random.PRNGKey(1), (B2, 3), jnp.float32)
    t2 = jax.random.normal(jax.random.PRNGKey(2), (B2, 1), jnp.float32)
    y2, loss2 = fwd(x2, w1, b1, w2, b2, t2, block_b=128, compute_dtype=jnp.float32)
    jax.block_until_ready((y2, loss2))
    y2_ref, loss2_ref = ref_forward(x2, t2)
    assert jnp.allclose(y2, y2_ref, atol=1e-4, rtol=1e-4)
    assert jnp.allclose(loss2, loss2_ref, atol=1e-4, rtol=1e-4)

    # 3) Default fast path: auto tiling (>= 2 tiles) + bf16 MXU fc1.
    B3 = 2048
    x3 = jax.random.normal(jax.random.PRNGKey(3), (B3, 3), jnp.float32)
    t3 = jax.random.normal(jax.random.PRNGKey(4), (B3, 1), jnp.float32)
    y3, loss3 = fwd(x3, w1, b1, w2, b2, t3)
    jax.block_until_ready((y3, loss3))
    y3_q, loss3_q = ref_forward_quant(x3, t3)        # tight vs quantized reference
    assert jnp.allclose(y3, y3_q, atol=1e-4, rtol=1e-4)
    assert jnp.allclose(loss3, loss3_q, atol=1e-4, rtol=1e-4)
    y3_ref, loss3_ref = ref_forward(x3, t3)          # loose vs true f32 reference
    assert jnp.allclose(y3, y3_ref, atol=1e-1, rtol=1e-1)
    assert jnp.allclose(loss3, loss3_ref, atol=1e-1, rtol=1e-1)

    print("KERNEL_OK")
</pallas_src>

<mosaic_0001>
module attributes {stable_mosaic.version = 11 : i64} {
  func.func @mlp_kernel(%arg0: i32, %arg1: memref<3x128xf32, #tpu.memory_space<vmem>>, %arg2: memref<3x64x1xf32, #tpu.memory_space<vmem>>, %arg3: memref<64x1xf32, #tpu.memory_space<vmem>>, %arg4: memref<64x1xf32, #tpu.memory_space<vmem>>, %arg5: memref<1x1xf32, #tpu.memory_space<vmem>>, %arg6: memref<1x128xf32, #tpu.memory_space<vmem>>, %arg7: memref<1x128xf32, #tpu.memory_space<vmem>>, %arg8: memref<1x128xf32, #tpu.memory_space<vmem>>) attributes {dimension_semantics = [#tpu.dimension_semantics<parallel>], iteration_bounds = array<i64: 1>, scalar_prefetch = 0 : i64, scratch_operands = 0 : i64, tpu.core_type = #tpu.core_type<tc>, window_params = [{transform_indices = @transform_0, window_bounds = array<i64: 3, 128>}, {pipeline_mode = #tpu.pipeline_mode<synchronous>, transform_indices = @transform_1, window_bounds = array<i64: 3, 64, 1>}, {pipeline_mode = #tpu.pipeline_mode<synchronous>, transform_indices = @transform_2, window_bounds = array<i64: 64, 1>}, {pipeline_mode = #tpu.pipeline_mode<synchronous>, transform_indices = @transform_3, window_bounds = array<i64: 64, 1>}, {pipeline_mode = #tpu.pipeline_mode<synchronous>, transform_indices = @transform_4, window_bounds = array<i64: 1, 1>}, {transform_indices = @transform_5, window_bounds = array<i64: 1, 128>}, {transform_indices = @transform_6, window_bounds = array<i64: 1, 128>}, {transform_indices = @transform_7, window_bounds = array<i64: 1, 128>}]} {
    %c0 = arith.constant 0 : index
    %c0_0 = arith.constant 0 : index
    %c0_1 = arith.constant 0 : index
    %0 = vector.load %arg2[%c0, %c0_0, %c0_1] : memref<3x64x1xf32, #tpu.memory_space<vmem>>, vector<1x64x1xf32>
    %1 = vector.shape_cast %0 : vector<1x64x1xf32> to vector<64x1xf32>
    %c0_2 = arith.constant 0 : index
    %c0_3 = arith.constant 0 : index
    %2 = vector.load %arg1[%c0_2, %c0_3] : memref<3x128xf32, #tpu.memory_space<vmem>>, vector<1x128xf32>
    %3 = vector.broadcast %1 : vector<64x1xf32> to vector<64x128xf32>
    %4 = vector.broadcast %2 : vector<1x128xf32> to vector<64x128xf32>
    %5 = arith.mulf %3, %4 : vector<64x128xf32>
    %c1 = arith.constant 1 : index
    %c0_4 = arith.constant 0 : index
    %c0_5 = arith.constant 0 : index
    %6 = vector.load %arg2[%c1, %c0_4, %c0_5] : memref<3x64x1xf32, #tpu.memory_space<vmem>>, vector<1x64x1xf32>
    %7 = vector.shape_cast %6 : vector<1x64x1xf32> to vector<64x1xf32>
    %c1_6 = arith.constant 1 : index
    %c0_7 = arith.constant 0 : index
    %8 = vector.load %arg1[%c1_6, %c0_7] : memref<3x128xf32, #tpu.memory_space<vmem>>, vector<1x128xf32>
    %9 = vector.broadcast %7 : vector<64x1xf32> to vector<64x128xf32>
    %10 = vector.broadcast %8 : vector<1x128xf32> to vector<64x128xf32>
    %11 = arith.mulf %9, %10 : vector<64x128xf32>
    %12 = arith.addf %5, %11 : vector<64x128xf32>
    %c2 = arith.constant 2 : index
    %c0_8 = arith.constant 0 : index
    %c0_9 = arith.constant 0 : index
    %13 = vector.load %arg2[%c2, %c0_8, %c0_9] : memref<3x64x1xf32, #tpu.memory_space<vmem>>, vector<1x64x1xf32>
    %14 = vector.shape_cast %13 : vector<1x64x1xf32> to vector<64x1xf32>
    %c2_10 = arith.constant 2 : index
    %c0_11 = arith.constant 0 : index
    %15 = vector.load %arg1[%c2_10, %c0_11] : memref<3x128xf32, #tpu.memory_space<vmem>>, vector<1x128xf32>
    %16 = vector.broadcast %14 : vector<64x1xf32> to vector<64x128xf32>
    %17 = vector.broadcast %15 : vector<1x128xf32> to vector<64x128xf32>
    %18 = arith.mulf %16, %17 : vector<64x128xf32>
    %19 = arith.addf %12, %18 : vector<64x128xf32>
    %c0_12 = arith.constant 0 : index
    %c0_13 = arith.constant 0 : index
    %20 = vector.load %arg3[%c0_12, %c0_13] : memref<64x1xf32, #tpu.memory_space<vmem>>, vector<64x1xf32>
    %21 = vector.broadcast %20 : vector<64x1xf32> to vector<64x128xf32>
    %22 = arith.addf %19, %21 : vector<64x128xf32>
    %cst = arith.constant 0.000000e+00 : f32
    %23 = vector.broadcast %cst : f32 to vector<64x128xf32>
    %24 = arith.maximumf %22, %23 : vector<64x128xf32>
    %c0_14 = arith.constant 0 : index
    %c0_15 = arith.constant 0 : index
    %25 = vector.load %arg4[%c0_14, %c0_15] : memref<64x1xf32, #tpu.memory_space<vmem>>, vector<64x1xf32>
    %26 = vector.broadcast %25 : vector<64x1xf32> to vector<64x128xf32>
    %27 = arith.mulf %26, %24 : vector<64x128xf32>
    %cst_16 = arith.constant dense<0.000000e+00> : vector<128xf32>
    %28 = vector.multi_reduction <add>, %27, %cst_16 [0] : vector<64x128xf32> to vector<128xf32>
    %29 = vector.shape_cast %28 : vector<128xf32> to vector<1x128xf32>
    %c0_17 = arith.constant 0 : index
    %c0_18 = arith.constant 0 : index
    %30 = vector.load %arg5[%c0_17, %c0_18] : memref<1x1xf32, #tpu.memory_space<vmem>>, vector<1x1xf32>
    %31 = vector.broadcast %30 : vector<1x1xf32> to vector<1x128xf32>
    %32 = arith.addf %29, %31 : vector<1x128xf32>
    %c0_19 = arith.constant 0 : index
    %c0_20 = arith.constant 0 : index
    %33 = vector.load %arg7[%c0_19, %c0_20] : memref<1x128xf32, #tpu.memory_space<vmem>>, vector<1x128xf32>
    tpu.vector_store %arg7[%c0_19, %c0_20], %32 {strides = array<i32>} : memref<1x128xf32, #tpu.memory_space<vmem>>, vector<1x128xf32>,
    %c0_21 = arith.constant 0 : index
    %c0_22 = arith.constant 0 : index
    %34 = vector.load %arg6[%c0_21, %c0_22] : memref<1x128xf32, #tpu.memory_space<vmem>>, vector<1x128xf32>
    %35 = arith.subf %32, %34 : vector<1x128xf32>
    %36 = tpu.iota {dimensions = array<i32: 1>} : vector<1x128xi32>
    %c128_i32 = arith.constant 128 : i32
    %37 = arith.muli %arg0, %c128_i32 : i32
    %38 = vector.broadcast %37 : i32 to vector<1x128xi32>
    %39 = arith.addi %36, %38 : vector<1x128xi32>
    %c8_i32 = arith.constant 8 : i32
    %40 = vector.broadcast %c8_i32 : i32 to vector<1x128xi32>
    %41 = arith.cmpi slt, %39, %40 : vector<1x128xi32>
    %cst_23 = arith.constant 0.000000e+00 : f32
    %42 = vector.broadcast %cst_23 : f32 to vector<1x128xf32>
    %43 = arith.select %41, %35, %42 : vector<1x128xi1>, vector<1x128xf32>
    %44 = arith.mulf %43, %43 : vector<1x128xf32>
    %cst_24 = arith.constant dense<0.000000e+00> : vector<1xf32>
    %45 = vector.multi_reduction <add>, %44, %cst_24 [1] : vector<1x128xf32> to vector<1xf32>
    %46 = vector.shape_cast %45 : vector<1xf32> to vector<1x1xf32>
    %47 = vector.shape_cast %46 : vector<1x1xf32> to vector<1x1xf32>
    %48 = vector.broadcast %47 : vector<1x1xf32> to vector<1x128xf32>
    %c0_25 = arith.constant 0 : index
    %c0_26 = arith.constant 0 : index
    %49 = vector.load %arg8[%c0_25, %c0_26] : memref<1x128xf32, #tpu.memory_space<vmem>>, vector<1x128xf32>
    tpu.vector_store %arg8[%c0_25, %c0_26], %48 {strides = array<i32>} : memref<1x128xf32, #tpu.memory_space<vmem>>, vector<1x128xf32>,
    return
  }
  func.func @transform_0(%arg0: i32) -> (i32, i32) {
    %c0_i32 = arith.constant 0 : i32
    %c0_i32_0 = arith.constant 0 : i32
    return %c0_i32, %arg0 : i32, i32
  }
  func.func @transform_1(%arg0: i32) -> (i32, i32, i32) {
    %c0_i32 = arith.constant 0 : i32
    %c0_i32_0 = arith.constant 0 : i32
    %c0_i32_1 = arith.constant 0 : i32
    %c0_i32_2 = arith.constant 0 : i32
    return %c0_i32, %c0_i32_0, %c0_i32_1 : i32, i32, i32
  }
  func.func @transform_2(%arg0: i32) -> (i32, i32) {
    %c0_i32 = arith.constant 0 : i32
    %c0_i32_0 = arith.constant 0 : i32
    %c0_i32_1 = arith.constant 0 : i32
    return %c0_i32, %c0_i32_0 : i32, i32
  }
  func.func @transform_3(%arg0: i32) -> (i32, i32) {
    %c0_i32 = arith.constant 0 : i32
    %c0_i32_0 = arith.constant 0 : i32
    %c0_i32_1 = arith.constant 0 : i32
    return %c0_i32, %c0_i32_0 : i32, i32
  }
  func.func @transform_4(%arg0: i32) -> (i32, i32) {
    %c0_i32 = arith.constant 0 : i32
    %c0_i32_0 = arith.constant 0 : i32
    %c0_i32_1 = arith.constant 0 : i32
    return %c0_i32, %c0_i32_0 : i32, i32
  }
  func.func @transform_5(%arg0: i32) -> (i32, i32) {
    %c0_i32 = arith.constant 0 : i32
    %c0_i32_0 = arith.constant 0 : i32
    return %c0_i32, %arg0 : i32, i32
  }
  func.func @transform_6(%arg0: i32) -> (i32, i32) {
    %c0_i32 = arith.constant 0 : i32
    %c0_i32_0 = arith.constant 0 : i32
    return %c0_i32, %arg0 : i32, i32
  }
  func.func @transform_7(%arg0: i32) -> (i32, i32) {
    %c0_i32 = arith.constant 0 : i32
    %c0_i32_0 = arith.constant 0 : i32
    return %c0_i32, %arg0 : i32, i32
  }
}

</mosaic_0001>

<bundles_post_ra>
// kernel: mlp_forward.1
= control target key start
LH: loop header
LB: loop body
LE: loop exit
PB: predicated region body
PF: predicated region fallthrough
CT: control target
= control target key end

     0   :  { %v418_v0 = vmov 0   ;;  %vm383_vm1 = vcmask 1040384   ;;  %s600_s1 = inlined_call_operand.vmem [shape: f32[3,64,1], index: 1, kind: input, shape index: {}]   ;;  %s601_s4 = inlined_call_operand.<no memory space> [shape: f32[1,1], index: 4, kind: input, shape index: {}]   ;;  %s602_s2 = inlined_call_operand.vmem [shape: f32[64,1], index: 2, kind: input, shape index: {}]   ;;  %s603_s3 = inlined_call_operand.vmem [shape: f32[64,1], index: 3, kind: input, shape index: {}]   ;;  %s604_s0 = inlined_call_operand.vmem [shape: f32[3,128], index: 0, kind: input, shape index: {}]   ;;  %s605_s5 = inlined_call_operand.vmem [shape: f32[1,128], index: 5, kind: input, shape index: {}]   ;;  %s606_s6 = inlined_call_operand.vmem [shape: f32[1,128], index: 6, kind: output, shape index: {0}]   ;;  %s607_s7 = inlined_call_operand.vmem [shape: f32[1,128], index: 7, kind: output, shape index: {1}]  }
   0x1   :  { %417 = vset.pattern.permute.xlu1 %v418_v0  ;;  %416 = vset.pattern.permute.xlu0 %v418_v0  ;;  %v397_v1 = vld [vmem:[%s600_s1 + $0x40] sm:$0xff]  ;;  %v13_v3 = vstv %s601_s4  ;;  %v398_v4 = vld [vmem:[%s600_s1 + $0x48] sm:$0xff]  ;;  %v399_v6 = vld [vmem:[%s600_s1 + $0x50] sm:$0xff] }
   0x2   :  { %v27_v2 = vld [vmem:[%s600_s1] sm:$0xff]  ;;  %100 = vperm.xlu1 %417, %v397_v1   ;;  %14 = vst [vmem:[#allocation2] sm:$0x1] %v13_v3  ;;  %v28_v5 = vld [vmem:[%s600_s1 + $0x8] sm:$0xff]  ;;  %v29_v7 = vld [vmem:[%s600_s1 + $0x10] sm:$0xff] }
   0x3   :  { %38 = vperm.xlu0 %416, %v27_v2   ;;  %v407_v8 = vld [vmem:[%s600_s1 + $0x88] sm:$0xff]  ;;  %v406_v9 = vld [vmem:[%s600_s1 + $0x80] sm:$0xff]  ;;  %v400_v10 = vld [vmem:[%s600_s1 + $0x58] sm:$0xff] }
   0x4   :  { %v30_v11 = vld [vmem:[%s600_s1 + $0x18] sm:$0xff]  ;;  %v31_v12 = vld [vmem:[%s600_s1 + $0x20] sm:$0xff]  ;;  %v408_v13 = vld [vmem:[%s600_s1 + $0x90] sm:$0xff] }
   0x5   :  { %v409_v14 = vld [vmem:[%s600_s1 + $0x98] sm:$0xff]  ;;  %v401_v15 = vld [vmem:[%s600_s1 + $0x60] sm:$0xff]  ;;  %v229_v16 = vld [vmem:[%s602_s2 + $0x8] sm:$0xff] }
   0x6   :  { %105 = vperm.xlu1 %417, %v398_v4   ;;  %v228_v17 = vld [vmem:[%s602_s2] sm:$0xff]  ;;  %v402_v18 = vld [vmem:[%s600_s1 + $0x68] sm:$0xff]  ;;  %v230_v20 = vld [vmem:[%s602_s2 + $0x10] sm:$0xff] }
   0x7   :  { %43 = vperm.xlu0 %416, %v28_v5   ;;  %v32_v19 = vld [vmem:[%s600_s1 + $0x28] sm:$0xff]  ;;  %v410_v21 = vld [vmem:[%s600_s1 + $0xa0] sm:$0xff]  ;;  %v403_v22 = vld [vmem:[%s600_s1 + $0x70] sm:$0xff] }
   0x8   :  { %v33_v23 = vld [vmem:[%s600_s1 + $0x30] sm:$0xff]  ;;  %v231_v24 = vld [vmem:[%s602_s2 + $0x18] sm:$0xff]  ;;  %v411_v25 = vld [vmem:[%s600_s1 + $0xa8] sm:$0xff] }
   0x9   :  { %v293_v26 = vld [vmem:[%s603_s3 + $0x8] sm:$0xff]  ;;  %v292_v27 = vld [vmem:[%s603_s3] sm:$0xff]  ;;  %v404_v28 = vld [vmem:[%s600_s1 + $0x78] sm:$0xff] }
   0xa   :  { %110 = vperm.xlu1 %417, %v399_v6   ;;  %v34_v29 = vld [vmem:[%s600_s1 + $0x38] sm:$0xff]  ;;  %v232_v30 = vld [vmem:[%s602_s2 + $0x20] sm:$0xff]  ;;  %v412_v31 = vld [vmem:[%s600_s1 + $0xb0] sm:$0xff] }
   0xb   :  { %48 = vperm.xlu0 %416, %v29_v7   ;;  %v413_v32 = vld [vmem:[%s600_s1 + $0xb8] sm:$0xff]  ;;  %v294_v33 = vld [vmem:[%s603_s3 + $0x10] sm:$0xff]  ;;  %v233_v35 = vld [vmem:[%s602_s2 + $0x28] sm:$0xff] }
   0xc   :  { %v295_v34 = vld [vmem:[%s603_s3 + $0x18] sm:$0xff]  ;;  %v296_v36 = vld [vmem:[%s603_s3 + $0x20] sm:$0xff]  ;;  %v234_v37 = vld [vmem:[%s602_s2 + $0x30] sm:$0xff] }
   0xd   :  { %v297_v38 = vld [vmem:[%s603_s3 + $0x28] sm:$0xff]  ;;  %v235_v39 = vld [vmem:[%s602_s2 + $0x38] sm:$0xff]  ;;  %v298_v41 = vld [vmem:[%s603_s3 + $0x30] sm:$0xff] }
   0xe   :  { %175 = vperm.xlu1 %417, %v407_v8   ;;  %v299_v40 = vld [vmem:[%s603_s3 + $0x38] sm:$0xff]  ;;  %v361_v42 = vld [vmem:[#allocation2] sm:$0x1]  ;;  %v405_v3 = vld [vmem:[%s604_s0 + $0x1] ss:$0 sm:$0xff] }
   0xf   :  { %170 = vperm.xlu0 %416, %v406_v9   ;;  %v396_v4 = vld [vmem:[%s604_s0] ss:$0 sm:$0xff]  ;;  %v414_v7 = vld [vmem:[%s604_s0 + $0x2] ss:$0 sm:$0xff] }
  0x12   :  { %115 = vperm.xlu1 %417, %v400_v10  }
  0x13   :  { %53 = vperm.xlu0 %416, %v30_v11  }
  0x16   :  { %58 = vperm.xlu1 %417, %v31_v12  }
  0x17   :  { %180 = vperm.xlu0 %416, %v408_v13  }
  0x1a   :  { %185 = vperm.xlu1 %417, %v409_v14  }
  0x1b   :  { %120 = vperm.xlu0 %416, %v401_v15  }
  0x1e   :  { %243 = vperm.xlu1 %417, %v229_v16  }
  0x1f   :  { %238 = vperm.xlu0 %416, %v228_v17  }
  0x22   :  { %125 = vperm.xlu1 %417, %v402_v18  }
  0x23   :  { %63 = vperm.xlu0 %416, %v32_v19  }
  0x26   :  { %248 = vperm.xlu1 %417, %v230_v20  }
  0x27   :  { %190 = vperm.xlu0 %416, %v410_v21  }
  0x2a   :  { %130 = vperm.xlu1 %417, %v403_v22  }
  0x2b   :  { %68 = vperm.xlu0 %416, %v33_v23  }
  0x2e   :  { %253 = vperm.xlu1 %417, %v231_v24  }
  0x2f   :  { %195 = vperm.xlu0 %416, %v411_v25  }
  0x32   :  { %307 = vperm.xlu1 %417, %v293_v26  }
  0x33   :  { %302 = vperm.xlu0 %416, %v292_v27  }
  0x36   :  { %135 = vperm.xlu1 %417, %v404_v28  }
  0x37   :  { %73 = vperm.xlu0 %416, %v34_v29  }
  0x3a   :  { %258 = vperm.xlu1 %417, %v232_v30  }
  0x3b   :  { %200 = vperm.xlu0 %416, %v412_v31  }
  0x3e   :  { %205 = vperm.xlu1 %417, %v413_v32  }
  0x3f   :  { %312 = vperm.xlu0 %416, %v294_v33  }
  0x42   :  { %317 = vperm.xlu1 %417, %v295_v34  }
  0x43   :  { %263 = vperm.xlu0 %416, %v233_v35  }
  0x46   :  { %322 = vperm.xlu1 %417, %v296_v36  }
  0x47   :  { %268 = vperm.xlu0 %416, %v234_v37  }
  0x4a   :  { %327 = vperm.xlu1 %417, %v297_v38  }
  0x4b   :  { %273 = vperm.xlu0 %416, %v235_v39  }
  0x4e   :  { %337 = vperm.xlu1 %417, %v299_v40  }
  0x4f   :  { %332 = vperm.xlu0 %416, %v298_v41  }
  0x53   :  { %364 = vperm.xlu0 %416, %v361_v42  }
  0x81   :  { %v101_v43 = vpop.permute.xlu1 %100 }
  0x82   :  { %v39_v44 = vpop.permute.xlu0 %38  ;;  %v142_v8 = vmul.f32 %v405_v3, %v101_v43 }
  0x83   :  { %v80_v9 = vmul.f32 %v396_v4, %v39_v44 }
  0x85   :  { %v106_v45 = vpop.permute.xlu1 %105  ;;  %v150_v19 = vadd.f32 %v142_v8, %v80_v9 }
  0x86   :  { %v44_v46 = vpop.permute.xlu0 %43  ;;  %v143_v10 = vmul.f32 %v405_v3, %v106_v45 }
  0x87   :  { %v81_v11 = vmul.f32 %v396_v4, %v44_v46 }
  0x89   :  { %v111_v47 = vpop.permute.xlu1 %110  ;;  %v151_v20 = vadd.f32 %v143_v10, %v81_v11 }
  0x8a   :  { %v49_v48 = vpop.permute.xlu0 %48  ;;  %v144_v12 = vmul.f32 %v405_v3, %v111_v47 }
  0x8b   :  { %v82_v13 = vmul.f32 %v396_v4, %v49_v48 }
  0x8d   :  { %v176_v49 = vpop.permute.xlu1 %175  ;;  %v152_v21 = vadd.f32 %v144_v12, %v82_v13 }
  0x8e   :  { %v171_v50 = vpop.permute.xlu0 %170  ;;  %v213_v14 = vmul.f32 %v414_v7, %v176_v49 }
  0x8f   :  { %v212_v15 = vmul.f32 %v414_v7, %v171_v50 }
  0x90   :  { %v221_v24 = vadd.f32 %v213_v14, %v151_v20 }
  0x91   :  { %v116_v51 = vpop.permute.xlu1 %115  ;;  %v220_v25 = vadd.f32 %v212_v15, %v150_v19 }
  0x92   :  { %v54_v52 = vpop.permute.xlu0 %53  ;;  %v145_v22 = vmul.f32 %v405_v3, %v116_v51 }
  0x93   :  { %v83_v23 = vmul.f32 %v396_v4, %v54_v52 }
  0x95   :  { %v59_v53 = vpop.permute.xlu1 %58  ;;  %v153_v35 = vadd.f32 %v145_v22, %v83_v23 }
  0x96   :  { %v181_v54 = vpop.permute.xlu0 %180  ;;  %v84_v36 = vmul.f32 %v396_v4, %v59_v53 }
  0x97   :  { %v214_v18 = vmul.f32 %v414_v7, %v181_v54 }
  0x99   :  { %v186_v55 = vpop.permute.xlu1 %185  ;;  %v222_v30 = vadd.f32 %v214_v18, %v152_v21 }
  0x9a   :  { %v121_v56 = vpop.permute.xlu0 %120  ;;  %v215_v28 = vmul.f32 %v414_v7, %v186_v55 }
  0x9b   :  { %v146_v29 = vmul.f32 %v405_v3, %v121_v56 }
  0x9c   :  { %v223_v43 = vadd.f32 %v215_v28, %v153_v35 }
  0x9d   :  { %v244_v57 = vpop.permute.xlu1 %243  ;;  %v154_v42 = vadd.f32 %v146_v29, %v84_v36  ;;  %v367_v29 = vlaneseq }
  0x9e   :  { %v239_v58 = vpop.permute.xlu0 %238  ;;  %v277_v31 = vadd.f32 %v244_v57, %v221_v24 }
  0x9f   :  { %v276_v32 = vadd.f32 %v239_v58, %v220_v25 }
  0xa0   :  { %v285_v44 = vmax.f32 %v277_v31, 0.0 }
  0xa1   :  { %v126_v59 = vpop.permute.xlu1 %125  ;;  %v284_v45 = vmax.f32 %v276_v32, 0.0  ;;  %v368_v32 = vshrl.u32 %v367_v29, 7 }
  0xa2   :  { %v64_v60 = vpop.permute.xlu0 %63  ;;  %v147_v33 = vmul.f32 %v405_v3, %v126_v59 }
  0xa3   :  { %v85_v34 = vmul.f32 %v396_v4, %v64_v60 }
  0xa5   :  { %v249_v61 = vpop.permute.xlu1 %248  ;;  %v155_v46 = vadd.f32 %v147_v33, %v85_v34  ;;  %v369_v34 = vsub.s32 0, %v368_v32 }
  0xa6   :  { %v191_v62 = vpop.permute.xlu0 %190  ;;  %v278_v38 = vadd.f32 %v249_v61, %v222_v30 }
  0xa7   :  { %v216_v37 = vmul.f32 %v414_v7, %v191_v62 }
  0xa8   :  { %v286_v51 = vmax.f32 %v278_v38, 0.0  ;;  %v376_v38 = vand.u32 127, %v367_v29 }
  0xa9   :  { %v131_v63 = vpop.permute.xlu1 %130  ;;  %v224_v50 = vadd.f32 %v216_v37, %v154_v42 }
  0xaa   :  { %v69_v0 = vpop.permute.xlu0 %68  ;;  %v148_v47 = vmul.f32 %v405_v3, %v131_v63  ;;  %vm380_vm0 = vcmp.lt.s32.totalorder %v376_v38, 8 }
  0xab   :  { %v86_v48 = vmul.f32 %v396_v4, %v69_v0 }
  0xad   :  { %v254_v1 = vpop.permute.xlu1 %253  ;;  %v156_v62 = vadd.f32 %v148_v47, %v86_v48 }
  0xae   :  { %v196_v2 = vpop.permute.xlu0 %195  ;;  %v279_v49 = vadd.f32 %v254_v1, %v223_v43 }
  0xaf   :  { %v217_v39 = vmul.f32 %v414_v7, %v196_v2 }
  0xb0   :  { %v287_v2 = vmax.f32 %v279_v49, 0.0 }
  0xb1   :  { %v308_v5 = vpop.permute.xlu1 %307  ;;  %v225_v53 = vadd.f32 %v217_v39, %v155_v46 }
  0xb2   :  { %v303_v6 = vpop.permute.xlu0 %302  ;;  %v341_v52 = vmul.f32 %v308_v5, %v285_v44 }
  0xb3   :  { %v340_v54 = vmul.f32 %v303_v6, %v284_v45 }
  0xb5   :  { %v136_v16 = vpop.permute.xlu1 %135  ;;  %v348_v10 = vadd.f32 %v341_v52, %v340_v54 }
  0xb6   :  { %v74_v17 = vpop.permute.xlu0 %73  ;;  %v149_v57 = vmul.f32 %v405_v3, %v136_v16 }
  0xb7   :  { %v87_v58 = vmul.f32 %v396_v4, %v74_v17 }
  0xb9   :  { %v259_v26 = vpop.permute.xlu1 %258  ;;  %v157_v1 = vadd.f32 %v149_v57, %v87_v58 }
  0xba   :  { %v201_v27 = vpop.permute.xlu0 %200  ;;  %v280_v59 = vadd.f32 %v259_v26, %v224_v50 }
  0xbb   :  { %v218_v60 = vmul.f32 %v414_v7, %v201_v27 }
  0xbc   :  { %v288_v11 = vmax.f32 %v280_v59, 0.0 }
  0xbd   :  { %v206_v40 = vpop.permute.xlu1 %205  ;;  %v226_v5 = vadd.f32 %v218_v60, %v156_v62 }
  0xbe   :  { %v313_v41 = vpop.permute.xlu0 %312  ;;  %v219_v8 = vmul.f32 %v414_v7, %v206_v40 }
  0xbf   :  { %v342_v61 = vmul.f32 %v313_v41, %v286_v51  ;;  %v373_v41 = vld [vmem:[%s605_s5] sm:$0x1] }
  0xc0   :  { %v227_v3 = vadd.f32 %v219_v8, %v157_v1 }
  0xc1   :  { %v318_v55 = vpop.permute.xlu1 %317  ;;  %v349_v6 = vadd.f32 %v348_v10, %v342_v61 }
  0xc2   :  { %v264_v56 = vpop.permute.xlu0 %263  ;;  %v343_v12 = vmul.f32 %v318_v55, %v287_v2 }
  0xc3   :  { %v281_v9 = vadd.f32 %v264_v56, %v225_v53 }
  0xc4   :  { %v350_v17 = vadd.f32 %v349_v6, %v343_v12 }
  0xc5   :  { %v323_v63 = vpop.permute.xlu1 %322  ;;  %v289_v13 = vmax.f32 %v281_v9, 0.0 }
  0xc6   :  { %v269_v0 = vpop.permute.xlu0 %268  ;;  %v344_v14 = vmul.f32 %v323_v63, %v288_v11 }
  0xc7   :  { %v282_v15 = vadd.f32 %v269_v0, %v226_v5 }
  0xc8   :  { %v351_v20 = vadd.f32 %v350_v17, %v344_v14 }
  0xc9   :  { %v328_v4 = vpop.permute.xlu1 %327  ;;  %v290_v7 = vmax.f32 %v282_v15, 0.0 }
  0xca   :  { %v274_v16 = vpop.permute.xlu0 %273  ;;  %v345_v18 = vmul.f32 %v328_v4, %v289_v13 }
  0xcb   :  { %v283_v19 = vadd.f32 %v274_v16, %v227_v3 }
  0xcc   :  { %v352_v24 = vadd.f32 %v351_v20, %v345_v18 }
  0xcd   :  { %v291_v21 = vmax.f32 %v283_v19, 0.0  ;;  %v338_v22 = vpop.permute.xlu1 %337 }
  0xce   :  { %v333_v23 = vpop.permute.xlu0 %332 }
  0xcf   :  { %v346_v25 = vmul.f32 %v333_v23, %v290_v7  ;;  %v347_v26 = vmul.f32 %v338_v22, %v291_v21 }
  0xd1   :  { %v353_v27 = vadd.f32 %v352_v24, %v346_v25 }
  0xd2   :  { %v365_v36 = vpop.permute.xlu0 %364 }
  0xd3   :  { %v354_v28 = vadd.f32 %v353_v27, %v347_v26  ;;  %v370_v40 = vrot.slane %v365_v36, %v369_v34 }
  0xd5   :  { %v355_v30 = vrot.slane %v354_v28, 4 }
  0xd7   :  { %v356_v31 = vadd.f32 %v355_v30, %v354_v28 }
  0xd9   :  { %v357_v33 = vrot.slane %v356_v31, 2 }
  0xdb   :  { %v358_v35 = vadd.f32 %v357_v33, %v356_v31 }
  0xdd   :  { %v359_v37 = vrot.slane %v358_v35, 1 }
  0xdf   :  { %v360_v39 = vadd.f32 %v359_v37, %v358_v35 }
  0xe1   :  { %v371_v42 = vadd.f32 %v370_v40, %v360_v39 }
  0xe3   :  { %372 = vst [vmem:[%s606_s6] sm:$0x1] %v371_v42  ;;  %v374_v43 = vsub.f32 %v371_v42, %v373_v41 }
  0xe5   :  { %v381_v44 = vsel %vm380_vm0, %v374_v43, 0.0 }
  0xe6   :  { %v382_v45 = vmul.f32 %v381_v44, %v381_v44 }
  0xe8   :  { %v384_v46 = vsel %vm383_vm1, %v382_v45, 0.0 }
  0xe9   :  { %385 = vadd.xlane.f32.xlu1 %v384_v46 }
 0x176   :  { %v386_v47 = vpop.xlane.xlu1 %385 }
 0x177   :  { %387 = vst [vmem:[%s607_s7] sm:$0x1] %v386_v47 }

</bundles_post_ra>
